<compile_context>
chip_gen: v6e
topology: v6e:2x2x1
jax: 0.10.0
libtpu: 0.0.40
codegen_flags: <defaults>
</compile_context>

<pallas_src>
import math

import jax
import jax.numpy as jnp
from jax import lax
from jax.experimental import pallas as pl
from jax.experimental.pallas import tpu as pltpu

LANES = 128
SUBLANES = 8
VMEM_LIMIT_BYTES = 32 * 1024 * 1024   # <= 3-deep 4096x128 f32 buffers with margin


def _round_up(x, m):
    return ((x + m - 1) // m) * m


def _device_caps():
    """(block_rows cap, use 2-chunk parallel axis) based on TPU generation."""
    cap, two_chunks = 2048, False
    try:
        kind = jax.devices()[0].device_kind.lower()
    except Exception:
        return cap, two_chunks
    if ('v6' in kind) or ('v7' in kind) or ('7x' in kind):
        cap = 4096          # faster HBM: amortize the ~0.35us per-step overhead
    if ('v7' in kind) or ('7x' in kind):
        two_chunks = True   # 2 TensorCores per chip
    return cap, two_chunks


def _make_pair_kernel(criterion, eps, scale, block_rows, rem_rows,
                      tiles_per_chunk, num_chunks):
    """Kernel computing scale * sum(criterion(pred - real)) for one pair."""
    need_mask = (rem_rows != block_rows)

    def kernel(pred_ref, real_ref, out_ref, acc_ref):
        c = pl.program_id(0)              # parallel chunk (v7x TensorCores)
        i = pl.program_id(1)              # reduction step within the chunk

        @pl.when(i == 0)
        def _():
            acc_ref[...] = jnp.zeros_like(acc_ref)

        diff = pred_ref[...].astype(jnp.float32) - real_ref[...].astype(jnp.float32)
        if criterion == 'l1':
            val = jnp.abs(diff)
        elif criterion == 'l2':
            val = diff * diff
        elif criterion == 'charbonnier':
            val = jnp.sqrt(diff * diff + jnp.float32(eps))
        else:
            raise ValueError(f'Unsupported criterion: {criterion}')

        if need_mask:
            # The last global tile hangs past the end of the array; rows past
            # rem_rows hold unspecified data and must not contribute.
            is_last = jnp.logical_and(c == num_chunks - 1,
                                      i == tiles_per_chunk - 1)
            bound = jnp.where(is_last, rem_rows, block_rows)
            row_ids = lax.broadcasted_iota(jnp.int32, (block_rows, LANES), 0)
            val = jnp.where(row_ids < bound, val, jnp.float32(0.0))

        # Reduce the tile to a single (8,128) block: sublane-aligned view,
        # pure VPU adds, no cross-lane work, no full-block accumulator traffic.
        acc_ref[...] += val.reshape(-1, SUBLANES, LANES).sum(axis=0)

        @pl.when(i == tiles_per_chunk - 1)
        def _():
            out_ref[...] = acc_ref[...] * jnp.float32(scale)

    return kernel


def _data_spec(block_rows, index_map, depth):
    if depth > 2:
        try:
            return pl.BlockSpec((block_rows, LANES), index_map,
                                pipeline_mode=pl.Buffered(depth))
        except (TypeError, AttributeError):
            pass
    return pl.BlockSpec((block_rows, LANES), index_map)


def _cost_estimate(nbytes_in, nelems, criterion, nbytes_out):
    try:
        return pl.CostEstimate(
            flops=4 * nelems,
            transcendentals=nelems if criterion == 'charbonnier' else 0,
            bytes_accessed=nbytes_in + nbytes_out)
    except Exception:
        return None


def _pair_reduced_criterion(pred, real, criterion, eps, reduction,
                            max_block_rows=None, force_two_chunks=None):
    """reduce(criterion(pred - real)) for a single feature pair -> f32 scalar.

    reduce = 'mean' or 'sum'.  One pallas_call, streaming the pair directly
    from its original HBM buffers (no slab / concatenate copy).
    """
    numel = int(pred.size)
    if numel == 0:
        return jnp.float32(0.0)

    cap, two_chunks = _device_caps()
    if max_block_rows is not None:
        cap = max(SUBLANES, _round_up(int(max_block_rows), SUBLANES))
    if force_two_chunks is not None:
        two_chunks = bool(force_two_chunks)

    scale = (1.0 / numel) if reduction == 'mean' else 1.0

    # Free bitcast for lane-aligned maps; only odd-sized (usually tiny
    # late-layer) maps pay a zero-pad copy up to the next 8x128 boundary.
    flat_p = jnp.ravel(pred)
    flat_r = jnp.ravel(real)
    pad = _round_up(numel, SUBLANES * LANES) - numel
    if pad:
        flat_p = jnp.pad(flat_p, (0, pad))
        flat_r = jnp.pad(flat_r, (0, pad))
    rows = (numel + pad) // LANES
    pred2d = flat_p.reshape(rows, LANES)
    real2d = flat_r.reshape(rows, LANES)

    block_rows = min(cap, rows)                       # both are multiples of 8
    num_tiles = -(-rows // block_rows)
    num_chunks = 2 if (two_chunks and num_tiles >= 2 and num_tiles % 2 == 0) else 1
    tiles_per_chunk = num_tiles // num_chunks
    rem_rows = rows - (num_tiles - 1) * block_rows    # valid rows in last tile

    kernel = _make_pair_kernel(criterion, eps, scale, block_rows, rem_rows,
                               tiles_per_chunk, num_chunks)

    def index_map(c, i, _tpc=tiles_per_chunk):
        return (c * _tpc + i, 0)

    depth = 3 if tiles_per_chunk >= 3 else 2
    in_specs = [_data_spec(block_rows, index_map, depth),
                _data_spec(block_rows, index_map, depth)]

    nbytes_in = (int(pred2d.size) * pred2d.dtype.itemsize
                 + int(real2d.size) * real2d.dtype.itemsize)

    out = pl.pallas_call(
        kernel,
        out_shape=jax.ShapeDtypeStruct((num_chunks * SUBLANES, LANES), jnp.float32),
        grid_spec=pltpu.PrefetchScalarGridSpec(
            num_scalar_prefetch=0,
            grid=(num_chunks, tiles_per_chunk),
            in_specs=in_specs,
            out_specs=pl.BlockSpec((SUBLANES, LANES), lambda c, i: (c, 0)),
            scratch_shapes=[pltpu.VMEM((SUBLANES, LANES), jnp.float32)],
        ),
        compiler_params=pltpu.CompilerParams(
            dimension_semantics=("parallel", "arbitrary"),
            vmem_limit_bytes=VMEM_LIMIT_BYTES),
        cost_estimate=_cost_estimate(nbytes_in, int(pred2d.size), criterion,
                                     num_chunks * SUBLANES * LANES * 4),
    )(pred2d, real2d)

    total = jnp.sum(out)
    if criterion == 'charbonnier' and pad:
        # Each explicit zero-pad element contributed sqrt(eps); remove it.
        total = total - jnp.float32(pad * math.sqrt(eps) * scale)
    return total


class GANFeatLoss:
    """JAX/Pallas port of basicsr.losses.GANFeatLoss (forward pass only).

    Note: like the PyTorch module, loss_weight is effectively applied twice
    (once inside the per-pair loss op, once in forward()).
    """

    def __init__(self, criterion='l1', loss_weight=1.0, reduction='mean'):
        if criterion not in ('l1', 'l2', 'charbonnier'):
            raise ValueError(
                f'Unsupported loss mode: {criterion}. '
                'Supported ones are: l1|l2|charbonnier')
        if reduction not in ('mean', 'sum'):
            # TODO(synk): reduction='none' (unreduced per-element output) is not supported here.
            raise ValueError('Only reduction="mean" or "sum" is implemented here.')
        self.criterion = criterion
        self.loss_weight = float(loss_weight)
        self.reduction = reduction
        self.eps = 1e-12   # only used by charbonnier

    def __call__(self, pred_fake, pred_real):
        num_d = len(pred_fake)
        if num_d == 0:
            return jnp.float32(0.0)
        total = jnp.float32(0.0)
        for i in range(num_d):
            num_intermediate_outputs = len(pred_fake[i]) - 1
            for j in range(num_intermediate_outputs):
                total = total + _pair_reduced_criterion(
                    pred_fake[i][j],
                    jax.lax.stop_gradient(pred_real[i][j]),   # .detach()
                    self.criterion, self.eps, self.reduction)
        # Matches the PyTorch module: loss_op applies loss_weight and forward()
        # multiplies by loss_weight again (loss_weight**2 overall).
        loss = (self.loss_weight * total) / num_d
        return loss * self.loss_weight


def _reference(pred_fake, pred_real, criterion='l1', loss_weight=1.0,
               reduction='mean', eps=1e-12):
    num_d = len(pred_fake)
    loss = jnp.float32(0.0)
    red = jnp.mean if reduction == 'mean' else jnp.sum
    for i in range(num_d):
        for j in range(len(pred_fake[i]) - 1):
            d = pred_fake[i][j].astype(jnp.float32) - pred_real[i][j].astype(jnp.float32)
            if criterion == 'l1':
                v = red(jnp.abs(d))
            elif criterion == 'l2':
                v = red(d * d)
            else:
                v = red(jnp.sqrt(d * d + eps))
            loss = loss + loss_weight * v / num_d
    return loss * loss_weight


if __name__ == "__main__":
    key = jax.random.PRNGKey(0)

    # Two multi-scale discriminators, each returning 3 intermediate features
    # plus a final prediction (the final entry is ignored by GANFeatLoss).
    # Second discriminator uses bf16 to exercise the native-dtype path.
    shapes_per_d = [
        [(2, 4, 16, 16), (2, 8, 8, 8), (2, 16, 4, 4), (2, 1, 4, 4)],
        [(2, 4, 8, 8), (2, 8, 4, 4), (2, 16, 2, 2), (2, 1, 2, 2)],
    ]
    dtypes_per_d = [jnp.float32, jnp.bfloat16]

    pred_fake, pred_real = [], []
    for d_shapes, dt in zip(shapes_per_d, dtypes_per_d):
        fk, rl = [], []
        for shp in d_shapes:
            key, k1, k2 = jax.random.split(key, 3)
            fk.append(jax.random.normal(k1, shp, dtype=dt))
            rl.append(jax.random.normal(k2, shp, dtype=dt))
        pred_fake.append(fk)
        pred_real.append(rl)

    for crit in ('l1', 'l2', 'charbonnier'):
        for red in ('mean', 'sum'):
            loss_mod = GANFeatLoss(criterion=crit, loss_weight=1.0, reduction=red)
            out = jax.block_until_ready(loss_mod(pred_fake, pred_real))
            ref = jax.block_until_ready(
                _reference(pred_fake, pred_real, criterion=crit,
                           loss_weight=1.0, reduction=red))
            assert jnp.allclose(out, ref, rtol=1e-4, atol=1e-5), (crit, red, out, ref)

    # Explicitly exercise the multi-tile, masked-tail and two-chunk code paths
    # (a tiny block_rows cap forces several grid steps at these small shapes).
    key, k1, k2 = jax.random.split(key, 3)
    big_p = jax.random.normal(k1, (2, 6, 16, 16), dtype=jnp.float32)  # 3072 elems -> 24 rows
    big_r = jax.random.normal(k2, (2, 6, 16, 16), dtype=jnp.float32)
    for crit in ('l1', 'l2', 'charbonnier'):
        for two in (False, True):
            got = _pair_reduced_criterion(big_p, big_r, crit, 1e-12, 'mean',
                                          max_block_rows=16, force_two_chunks=two)
            d = big_p - big_r
            if crit == 'l1':
                want = jnp.mean(jnp.abs(d))
            elif crit == 'l2':
                want = jnp.mean(d * d)
            else:
                want = jnp.mean(jnp.sqrt(d * d + 1e-12))
            got, want = jax.block_until_ready((got, want))
            assert jnp.allclose(got, want, rtol=1e-4, atol=1e-6), (crit, two, got, want)

    print("KERNEL_OK")
</pallas_src>

<mosaic_0001>
module attributes {stable_mosaic.version = 11 : i64} {
  func.func @kernel(%arg0: i32, %arg1: i32, %arg2: memref<16x128xf32, #tpu.memory_space<vmem>>, %arg3: memref<16x128xf32, #tpu.memory_space<vmem>>, %arg4: memref<8x128xf32, #tpu.memory_space<vmem>>, %arg5: memref<8x128xf32, #tpu.memory_space<vmem>>) attributes {dimension_semantics = [#tpu.dimension_semantics<parallel>, #tpu.dimension_semantics<arbitrary>], iteration_bounds = array<i64: 1, 1>, scalar_prefetch = 0 : i64, scratch_operands = 1 : i64, tpu.core_type = #tpu.core_type<tc>, window_params = [{transform_indices = @transform_0, window_bounds = array<i64: 16, 128>}, {transform_indices = @transform_1, window_bounds = array<i64: 16, 128>}, {transform_indices = @transform_2, window_bounds = array<i64: 8, 128>}]} {
    %c0_i32 = arith.constant 0 : i32
    %0 = arith.cmpi eq, %arg1, %c0_i32 : i32
    %1 = arith.extui %0 : i1 to i32
    %c0_i32_0 = arith.constant 0 : i32
    %2 = arith.cmpi ne, %1, %c0_i32_0 : i32
    scf.if %2 {
      %cst_10 = arith.constant 0.000000e+00 : f32
      %15 = vector.broadcast %cst_10 : f32 to vector<8x128xf32>
      %c0_11 = arith.constant 0 : index
      %c0_12 = arith.constant 0 : index
      %16 = vector.load %arg5[%c0_11, %c0_12] : memref<8x128xf32, #tpu.memory_space<vmem>>, vector<8x128xf32>
      tpu.vector_store %arg5[%c0_11, %c0_12], %15 {strides = array<i32>} : memref<8x128xf32, #tpu.memory_space<vmem>>, vector<8x128xf32>,
    } else {
    }
    %c0 = arith.constant 0 : index
    %c0_1 = arith.constant 0 : index
    %3 = vector.load %arg2[%c0, %c0_1] : memref<16x128xf32, #tpu.memory_space<vmem>>, vector<16x128xf32>
    %c0_2 = arith.constant 0 : index
    %c0_3 = arith.constant 0 : index
    %4 = vector.load %arg3[%c0_2, %c0_3] : memref<16x128xf32, #tpu.memory_space<vmem>>, vector<16x128xf32>
    %5 = arith.subf %3, %4 : vector<16x128xf32>
    %6 = math.absf %5 : vector<16x128xf32>
    %c0_4 = arith.constant 0 : index
    %c0_5 = arith.constant 0 : index
    %7 = vector.load %arg5[%c0_4, %c0_5] : memref<8x128xf32, #tpu.memory_space<vmem>>, vector<8x128xf32>
    %8 = vector.shape_cast %6 : vector<16x128xf32> to vector<2x8x128xf32>
    %cst = arith.constant dense<0.000000e+00> : vector<8x128xf32>
    %9 = vector.multi_reduction <add>, %8, %cst [0] : vector<2x8x128xf32> to vector<8x128xf32>
    %10 = arith.addf %7, %9 : vector<8x128xf32>
    %c0_6 = arith.constant 0 : index
    %c0_7 = arith.constant 0 : index
    %11 = vector.load %arg5[%c0_6, %c0_7] : memref<8x128xf32, #tpu.memory_space<vmem>>, vector<8x128xf32>
    tpu.vector_store %arg5[%c0_6, %c0_7], %10 {strides = array<i32>} : memref<8x128xf32, #tpu.memory_space<vmem>>, vector<8x128xf32>,
    %c0_i32_8 = arith.constant 0 : i32
    %12 = arith.cmpi eq, %arg1, %c0_i32_8 : i32
    %13 = arith.extui %12 : i1 to i32
    %c0_i32_9 = arith.constant 0 : i32
    %14 = arith.cmpi ne, %13, %c0_i32_9 : i32
    scf.if %14 {
      %c0_10 = arith.constant 0 : index
      %c0_11 = arith.constant 0 : index
      %15 = vector.load %arg5[%c0_10, %c0_11] : memref<8x128xf32, #tpu.memory_space<vmem>>, vector<8x128xf32>
      %cst_12 = arith.constant 4.8828125E-4 : f32
      %16 = vector.broadcast %cst_12 : f32 to vector<8x128xf32>
      %17 = arith.mulf %15, %16 : vector<8x128xf32>
      %c0_13 = arith.constant 0 : index
      %c0_14 = arith.constant 0 : index
      %18 = vector.load %arg4[%c0_13, %c0_14] : memref<8x128xf32, #tpu.memory_space<vmem>>, vector<8x128xf32>
      tpu.vector_store %arg4[%c0_13, %c0_14], %17 {strides = array<i32>} : memref<8x128xf32, #tpu.memory_space<vmem>>, vector<8x128xf32>,
    } else {
    }
    return
  }
  func.func @transform_0(%arg0: i32, %arg1: i32) -> (i32, i32) {
    %c1_i32 = arith.constant 1 : i32
    %0 = arith.muli %arg0, %c1_i32 : i32
    %1 = arith.addi %0, %arg1 : i32
    %c0_i32 = arith.constant 0 : i32
    %c0_i32_0 = arith.constant 0 : i32
    return %1, %c0_i32 : i32, i32
  }
  func.func @transform_1(%arg0: i32, %arg1: i32) -> (i32, i32) {
    %c1_i32 = arith.constant 1 : i32
    %0 = arith.muli %arg0, %c1_i32 : i32
    %1 = arith.addi %0, %arg1 : i32
    %c0_i32 = arith.constant 0 : i32
    %c0_i32_0 = arith.constant 0 : i32
    return %1, %c0_i32 : i32, i32
  }
  func.func @transform_2(%arg0: i32, %arg1: i32) -> (i32, i32) {
    %c0_i32 = arith.constant 0 : i32
    %c0_i32_0 = arith.constant 0 : i32
    return %arg0, %c0_i32 : i32, i32
  }
}

</mosaic_0001>

<bundles_post_ra>
// kernel: tpu_custom_call.1
= control target key start
LH: loop header
LB: loop body
LE: loop exit
PB: predicated region body
PF: predicated region fallthrough
CT: control target
= control target key end

     0   :  { %7 = vsyncpa [#allocation4], 0  ;;  %s191_s0 = inlined_call_operand.hbm [shape: f32[16,128], index: 0, kind: input, shape index: {}]   ;;  %s192_s1 = inlined_call_operand.hbm [shape: f32[16,128], index: 1, kind: input, shape index: {}]   ;;  %s193_s2 = inlined_call_operand.hbm [shape: f32[8,128], index: 2, kind: output, shape index: {}]  }
   0x1   :  { %8 = vsyncpa [#allocation7], 0 }
   0x2   :  { %9 = vsyncpa [#allocation5], 0  ;;  %s162_s9 = smov [#allocation3]  }
   0x3   :  { %s19_s10 = sshll.u32 %s162_s9, 4  ;;  %s20_s10 = int_to_ptr.vmem [resolvable:$true] %s19_s10 }
   0x4   :  { %s104_s11 = scalar_lea.vmem %s20_s10, 256  ;;  %p109_p1 = scmp.lt.s32.totalorder %s20_s10, %s20_s10 }
   0x5   :  { %p105_p0 = scmp.ne.s32.totalorder %s20_s10, %s104_s11  ;;  %p110_p2 = scmp.lt.s32.totalorder %s104_s11, %s104_s11 }
   0x7   :  { %p111_p3 = por %p110_p2, %p109_p1 }
   0x9   :  { %p112_p4 = pnand %p111_p3, %p105_p0 }
   0xb   :  { %115 = shalt.err (!%p112_p4)
}
   0xc   :  { %s163_s12 = smov 128   ;;  %s164_s13 = smov 8  }
   0xd   :  { %25 = dma.hbm_to_vmem [thread:$0]  %s191_s0, 256, %s20_s10, [#allocation4], %s163_s12, %s163_s12, %s164_s13  }
   0xe   :  { %s165_s16 = smov [#allocation6]  }
   0xf   :  { %s35_s17 = sshll.u32 %s165_s16, 4  ;;  %s36_s17 = int_to_ptr.vmem [resolvable:$true] %s35_s17 }
  0x10   :  { %s124_s18 = scalar_lea.vmem %s36_s17, 256  ;;  %p129_p6 = scmp.lt.s32.totalorder %s36_s17, %s36_s17 }
  0x11   :  { %p125_p5 = scmp.ne.s32.totalorder %s36_s17, %s124_s18  ;;  %p130_p7 = scmp.lt.s32.totalorder %s124_s18, %s124_s18 }
  0x13   :  { %p131_p8 = por %p130_p7, %p129_p6 }
  0x15   :  { %p132_p9 = pnand %p131_p8, %p125_p5 }
  0x17   :  { %135 = shalt.err (!%p132_p9)
}
  0x18   :  { %41 = dma.hbm_to_vmem [thread:$0]  %s192_s1, 256, %s36_s17, [#allocation7], %s163_s12, %s163_s12, %s164_s13  }
  0x19   :  { %156 = dma.done.wait [#allocation4], 256  }
  0x1a   :  { %157 = vsyncadd [#allocation4], 4294967040 }
  0x1b   :  { %158 = dma.done.wait [#allocation7], 256  }
  0x1c   :  { %159 = vsyncadd [#allocation7], 4294967040  ;;  %v57_v0 = vld [vmem:[#allocation3] sm:$0xff]  ;;  %v58_v1 = vld [vmem:[#allocation3 + $0x8] sm:$0xff]  ;;  %s166_s0 = smov [#allocation8]  }
  0x1d   :  { %v59_v2 = vld [vmem:[#allocation6] sm:$0xff]  ;;  %v60_v3 = vld [vmem:[#allocation6 + $0x8] sm:$0xff]  ;;  %s81_s21 = sshll.u32 %s166_s0, 4  ;;  %s82_s21 = int_to_ptr.vmem [resolvable:$true] %s81_s21 }
  0x1e   :  { %v61_v4 = vsub.f32 %v57_v0, %v59_v2  ;;  %v62_v5 = vsub.f32 %v58_v1, %v60_v3  ;;  %s136_s22 = scalar_lea.vmem %s82_s21, 128  ;;  %p141_p11 = scmp.lt.s32.totalorder %s82_s21, %s82_s21 }
  0x1f   :  { %p137_p10 = scmp.ne.s32.totalorder %s82_s21, %s136_s22  ;;  %p142_p12 = scmp.lt.s32.totalorder %s136_s22, %s136_s22 }
  0x20   :  { %v63_v6 = vand.u32 2147483647, %v61_v4  ;;  %v64_v7 = vand.u32 2147483647, %v62_v5 }
  0x21   :  { %p143_p13 = por %p142_p12, %p141_p11 }
  0x22   :  { %v66_v8 = vadd.f32 %v64_v7, %v63_v6 }
  0x23   :  { %p144_p0 = pnand %p143_p13, %p137_p10 }
  0x24   :  { %v73_v9 = vmul.f32 0.00048828125, %v66_v8 }
  0x26   :  { %74 = vst [vmem:[#allocation8] sm:$0xff] %v73_v9 }
  0x27   :  { %147 = shalt.err (!%p144_p0)
}
  0x28   :  { %84 = dma.vmem_to_hbm [thread:$0]  %s82_s21, 128, %s193_s2, [#allocation5]  }
  0x29   :  { %160 = dma.done.wait [#allocation5], 128  }
  0x2a   :  { %161 = vsyncadd [#allocation5], 4294967168 }
  0x2b   :  { %88 = vsyncpa [#allocation4], 1 }
  0x2c   :  { %89 = vsyncpa [#allocation7], 1 }
  0x2d   :  { %90 = vsyncpa [#allocation5], 1 }

</bundles_post_ra>
